<compile_context>
chip_gen: v6e
topology: v6e:2x2x1
jax: 0.10.0
libtpu: 0.0.40
codegen_flags: <defaults>
</compile_context>

<pallas_src>
import jax
import jax.numpy as jnp
import numpy as np
from jax import lax
from jax.experimental import pallas as pl
from jax.experimental.pallas import tpu as pltpu


def _round_up(n, m):
    return ((n + m - 1) // m) * m


def _device_kind():
    try:
        return jax.devices()[0].device_kind.lower()
    except Exception:
        return ""


def _default_vmem_limit(kind):
    if "v7" in kind:
        return 56 * 1024 * 1024           # 64 MiB physical VMEM per TC
    if any(g in kind for g in ("v4", "v5", "v6")):
        return 100 * 1024 * 1024          # 128 MiB physical VMEM
    return 48 * 1024 * 1024               # conservative fallback


def position_attention(x_nchw, wb, bb, wc, bc, wd, bd, alpha, *,
                       tq=None, bf16_exp=None, vmem_limit_bytes=None):
    """DANet position-attention forward.

    x_nchw : (B, C, H, W) float32
    wb, wc : (C//8, C)    1x1 conv weights (PyTorch conv weight[:, :, 0, 0])
    wd     : (C, C)
    bb, bc : (C//8,) ; bd : (C,)
    alpha  : scalar residual scale
    """
    B, C, H, W = x_nchw.shape
    HW = H * W
    c8 = wb.shape[0]
    c8p = _round_up(c8, 8)          # pad thin projections to 8 sublanes
    cf = 2 * c8p + C                # fused projection output channels

    kind = _device_kind()
    if tq is None:
        tq_pref = 256 if any(g in kind for g in ("v4", "v5", "v6")) else 128
        tq = min(tq_pref, _round_up(HW, 128))
    assert tq % 128 == 0, tq
    HWp = _round_up(HW, tq)         # padded spatial extent
    n_q = HWp // tq                 # query tiles (also projection chunks)
    if bf16_exp is None:
        # bf16 EUP exp only on v6e / v7x; older chips keep f32 exp.
        bf16_exp = bool(kind) and not any(g in kind for g in ("v2", "v3", "v4", "v5"))
    if vmem_limit_bytes is None:
        vmem_limit_bytes = _default_vmem_limit(kind)

    f32 = jnp.float32
    bf16 = jnp.bfloat16

    # (B, C, H, W) -> (B, C, HW): free reshape; zero-pad spatial axis to HWp.
    x = x_nchw.reshape(B, C, HW).astype(f32)
    if HWp != HW:
        x = jnp.pad(x, ((0, 0), (0, 0), (0, HWp - HW)))
    x_bf = x.astype(bf16)           # resident projection input (half-size slab)

    # Fused projection weight, row blocks = [Wb (padded) | Wd | Wc (padded)].
    wb_p = jnp.zeros((c8p, C), f32).at[:c8].set(wb.astype(f32))
    wc_p = jnp.zeros((c8p, C), f32).at[:c8].set(wc.astype(f32))
    bb_p = jnp.zeros((c8p,), f32).at[:c8].set(bb.astype(f32))
    bc_p = jnp.zeros((c8p,), f32).at[:c8].set(bc.astype(f32))
    w_all = jnp.concatenate([wb_p, wd.astype(f32), wc_p], axis=0).astype(bf16)
    b_all = jnp.concatenate([bb_p, bd.astype(f32), bc_p], axis=0).reshape(cf, 1)
    alpha2 = jnp.asarray(alpha, f32).reshape(1, 1)

    def kernel(x_bf_ref, w_ref, b_ref, alpha_ref, x_res_ref, o_ref,
               fb_ref, fc_ref, fd_ref):
        # ---- once per batch element: CHUNKED fused 1x1-conv projection ------
        @pl.when(pl.program_id(1) == 0)
        def _project():
            a = alpha_ref[0, 0]

            def proj_chunk(c0):
                xb = x_bf_ref[:, pl.ds(c0, tq)]                         # (C, tq) bf16
                p = jnp.dot(w_ref[...], xb,
                            preferred_element_type=jnp.float32)         # (cf, tq)
                p = p + b_ref[...]                                       # per-channel bias
                fb_ref[:, pl.ds(c0, tq)] = p[0:c8p, :].astype(bf16)
                # alpha folded into feat_d -> per-tile epilogue is just e + x.
                fd_ref[:, pl.ds(c0, tq)] = (a * p[c8p:c8p + C, :]).astype(bf16)
                fc_ref[:, pl.ds(c0, tq)] = p[c8p + C:, :].astype(bf16)

            if n_q <= 8:                 # unrolled: full LLO scheduler visibility
                for l in range(n_q):
                    proj_chunk(l * tq)
            else:                        # rolled: bounded code size at prod sizes
                @pl.loop(0, n_q)
                def _(l):
                    proj_chunk(pl.multiple_of(l * tq, tq))

        # ---- per query tile ---------------------------------------------------
        q0 = pl.multiple_of(pl.program_id(1) * tq, tq)
        fb_q = fb_ref[:, pl.ds(q0, tq)]                                  # (c8p, tq) bf16

        # energy: s[i, j] = <feat_b[:, q0+i], feat_c[:, j]>  (padded rows are 0)
        s = lax.dot_general(fb_q, fc_ref[...], (((0,), (0,)), ((), ())),
                            preferred_element_type=jnp.float32)          # (tq, HWp)
        if HWp != HW:
            # mask the zero-padded key columns out of the softmax
            key_idx = lax.broadcasted_iota(jnp.int32, (tq, HWp), 1)
            s = jnp.where(key_idx < HW, s, -jnp.inf)

        # numerically-stable softmax over the key axis
        s_max = jnp.max(s, axis=-1, keepdims=True)
        z = s - s_max
        p_exp = jnp.exp(z.astype(bf16)) if bf16_exp else jnp.exp(z)
        p_f32 = p_exp.astype(jnp.float32)
        denom = jnp.sum(p_f32, axis=-1, keepdims=True)
        attn = (p_f32 * pl.reciprocal(denom, approx=True)).astype(bf16)

        # feat_e (alpha already folded): e[c, i] = sum_j fd[c, j] * attn[i, j]
        e = lax.dot_general(fd_ref[...], attn, (((1,), (1,)), ((), ())),
                            preferred_element_type=jnp.float32)          # (C, tq)
        o_ref[...] = (e + x_res_ref[...]).astype(o_ref.dtype)

    out = pl.pallas_call(
        kernel,
        out_shape=jax.ShapeDtypeStruct((B, C, HWp), f32),
        grid=(B, n_q),
        in_specs=[
            # bf16 projection slab: same block for all query tiles => resident,
            # DMA'd once per batch element.
            pl.BlockSpec((None, C, HWp), lambda b, q: (b, 0, 0)),
            pl.BlockSpec((cf, C), lambda b, q: (0, 0)),           # fused weight
            pl.BlockSpec((cf, 1), lambda b, q: (0, 0)),           # fused bias
            pl.BlockSpec(memory_space=pltpu.MemorySpace.SMEM),    # alpha scalar
            # small f32 per-tile block, only for the exact residual add
            pl.BlockSpec((None, C, tq), lambda b, q: (b, 0, q)),
        ],
        out_specs=pl.BlockSpec((None, C, tq), lambda b, q: (b, 0, q)),
        scratch_shapes=[
            pltpu.VMEM((c8p, HWp), bf16),   # feat_b (query side, un-transposed)
            pltpu.VMEM((c8p, HWp), bf16),   # feat_c (key side)
            pltpu.VMEM((C, HWp), bf16),     # alpha * feat_d (key side)
        ],
        compiler_params=pltpu.CompilerParams(
            dimension_semantics=("parallel", "arbitrary"),
            vmem_limit_bytes=vmem_limit_bytes),
    )(x_bf, w_all, b_all, alpha2, x)

    if HWp != HW:
        out = out[:, :, :HW]
    return out.reshape(B, C, H, W)


def _reference(x, wb, bb, wc, bc, wd, bd, alpha):
    """Pure-JAX float32 replica of the PyTorch forward (NCHW, torch weight layout)."""
    B, C, H, W = x.shape
    xf = x.reshape(B, C, H * W)
    fb = jnp.einsum('oc,bci->boi', wb, xf) + bb[None, :, None]   # (B, C8, HW)
    fc = jnp.einsum('oc,bci->boi', wc, xf) + bc[None, :, None]   # (B, C8, HW)
    fd = jnp.einsum('oc,bci->boi', wd, xf) + bd[None, :, None]   # (B, C,  HW)
    s = jnp.einsum('bki,bkj->bij', fb, fc)        # bmm(feat_b^T, feat_c)
    a = jax.nn.softmax(s, axis=-1)
    e = jnp.einsum('bcj,bij->bci', fd, a)         # bmm(feat_d, attn^T)
    return (alpha * e + xf).reshape(B, C, H, W)


if __name__ == "__main__":
    key = jax.random.PRNGKey(0)

    def make_params(key, C):
        C8 = C // 8
        ks = jax.random.split(key, 6)
        s = 0.1
        wb = s * jax.random.normal(ks[0], (C8, C), dtype=jnp.float32)
        bb = s * jax.random.normal(ks[1], (C8,), dtype=jnp.float32)
        wc = s * jax.random.normal(ks[2], (C8, C), dtype=jnp.float32)
        bc = s * jax.random.normal(ks[3], (C8,), dtype=jnp.float32)
        wd = s * jax.random.normal(ks[4], (C, C), dtype=jnp.float32)
        bd = s * jax.random.normal(ks[5], (C,), dtype=jnp.float32)
        return wb, bb, wc, bc, wd, bd

    kx1, kp1, kx2, kp2 = jax.random.split(key, 4)
    # nn.Parameter(torch.zeros(1)) in the module; use a nonzero value here so
    # the attention path is actually exercised and verified.
    alpha = jnp.float32(0.5)

    # Case 1: HW a multiple of 128, multiple query tiles (tq=128, grid=(2, 2)).
    B, C, H, W = 2, 32, 16, 16
    x1 = jax.random.normal(kx1, (B, C, H, W), dtype=jnp.float32)
    p1 = make_params(kp1, C)
    out1 = jax.block_until_ready(position_attention(x1, *p1, alpha, tq=128))
    ref1 = _reference(x1, *p1, alpha)
    np.testing.assert_allclose(np.asarray(out1), np.asarray(ref1),
                               rtol=1e-2, atol=1e-2)

    # Case 2: HW NOT a multiple of 128 -> exercises zero-padding + key masking.
    B, C, H, W = 1, 32, 10, 10
    x2 = jax.random.normal(kx2, (B, C, H, W), dtype=jnp.float32)
    p2 = make_params(kp2, C)
    out2 = jax.block_until_ready(position_attention(x2, *p2, alpha))
    ref2 = _reference(x2, *p2, alpha)
    np.testing.assert_allclose(np.asarray(out2), np.asarray(ref2),
                               rtol=1e-2, atol=1e-2)

    print("KERNEL_OK")
</pallas_src>

<mosaic_0001>
module attributes {stable_mosaic.version = 11 : i64} {
  func.func @kernel(%arg0: i32, %arg1: i32, %arg2: memref<1x32x256xbf16, #tpu.memory_space<vmem>>, %arg3: memref<48x32xbf16, #tpu.memory_space<vmem>>, %arg4: memref<48x1xf32, #tpu.memory_space<vmem>>, %arg5: memref<1x1xf32, #tpu.memory_space<smem>>, %arg6: memref<1x32x128xf32, #tpu.memory_space<vmem>>, %arg7: memref<1x32x128xf32, #tpu.memory_space<vmem>>, %arg8: memref<8x256xbf16, #tpu.memory_space<vmem>>, %arg9: memref<8x256xbf16, #tpu.memory_space<vmem>>, %arg10: memref<32x256xbf16, #tpu.memory_space<vmem>>) attributes {dimension_semantics = [#tpu.dimension_semantics<parallel>, #tpu.dimension_semantics<arbitrary>], iteration_bounds = array<i64: 2, 2>, scalar_prefetch = 0 : i64, scratch_operands = 3 : i64, tpu.core_type = #tpu.core_type<tc>, window_params = [{transform_indices = @transform_0, window_bounds = array<i64: 1, 32, 256>}, {pipeline_mode = #tpu.pipeline_mode<synchronous>, transform_indices = @transform_1, window_bounds = array<i64: 48, 32>}, {pipeline_mode = #tpu.pipeline_mode<synchronous>, transform_indices = @transform_2, window_bounds = array<i64: 48, 1>}, {transform_indices = @transform_3, window_bounds = array<i64: 1, 1>}, {transform_indices = @transform_4, window_bounds = array<i64: 1, 32, 128>}, {transform_indices = @transform_5, window_bounds = array<i64: 1, 32, 128>}]} {
    %c0_i32 = arith.constant 0 : i32
    %0 = arith.cmpi eq, %arg1, %c0_i32 : i32
    %1 = arith.extui %0 : i1 to i32
    %c0_i32_0 = arith.constant 0 : i32
    %2 = arith.cmpi ne, %1, %c0_i32_0 : i32
    scf.if %2 {
      %c0_14 = arith.constant 0 : index
      %c0_15 = arith.constant 0 : index
      %30 = memref.load %arg5[%c0_14, %c0_15] : memref<1x1xf32, #tpu.memory_space<smem>>
      %c0_16 = arith.constant 0 : index
      %c0_17 = arith.constant 0 : index
      %c0_18 = arith.constant 0 : index
      %31 = vector.load %arg2[%c0_16, %c0_17, %c0_18] : memref<1x32x256xbf16, #tpu.memory_space<vmem>>, vector<1x32x128xbf16>
      %32 = vector.shape_cast %31 : vector<1x32x128xbf16> to vector<32x128xbf16>
      %c0_19 = arith.constant 0 : index
      %c0_20 = arith.constant 0 : index
      %33 = vector.load %arg3[%c0_19, %c0_20] : memref<48x32xbf16, #tpu.memory_space<vmem>>, vector<48x32xbf16>
      %cst_21 = arith.constant dense<0.000000e+00> : vector<48x128xf32>
      %34 = tpu.matmul %33, %32, %cst_21 {dimension_numbers = #tpu.dot_dimension_numbers<[1], [0], [0], [1], [0, 0, 1, 1], [], []>} : vector<48x32xbf16>, vector<32x128xbf16>, vector<48x128xf32> -> vector<48x128xf32>
      %c0_22 = arith.constant 0 : index
      %c0_23 = arith.constant 0 : index
      %35 = vector.load %arg4[%c0_22, %c0_23] : memref<48x1xf32, #tpu.memory_space<vmem>>, vector<48x1xf32>
      %36 = vector.broadcast %35 : vector<48x1xf32> to vector<48x128xf32>
      %37 = arith.addf %34, %36 : vector<48x128xf32>
      %38 = vector.extract_strided_slice %37 {offsets = [0, 0], sizes = [8, 128], strides = [1, 1]} : vector<48x128xf32> to vector<8x128xf32>
      %39 = arith.truncf %38 : vector<8x128xf32> to vector<8x128xbf16>
      %c0_24 = arith.constant 0 : index
      %c0_25 = arith.constant 0 : index
      %40 = vector.load %arg8[%c0_24, %c0_25] : memref<8x256xbf16, #tpu.memory_space<vmem>>, vector<8x128xbf16>
      tpu.vector_store %arg8[%c0_24, %c0_25], %39 {strides = array<i32>} : memref<8x256xbf16, #tpu.memory_space<vmem>>, vector<8x128xbf16>,
      %41 = vector.extract_strided_slice %37 {offsets = [8, 0], sizes = [32, 128], strides = [1, 1]} : vector<48x128xf32> to vector<32x128xf32>
      %42 = vector.broadcast %30 : f32 to vector<32x128xf32>
      %43 = arith.mulf %42, %41 : vector<32x128xf32>
      %44 = arith.truncf %43 : vector<32x128xf32> to vector<32x128xbf16>
      %c0_26 = arith.constant 0 : index
      %c0_27 = arith.constant 0 : index
      %45 = vector.load %arg10[%c0_26, %c0_27] : memref<32x256xbf16, #tpu.memory_space<vmem>>, vector<32x128xbf16>
      tpu.vector_store %arg10[%c0_26, %c0_27], %44 {strides = array<i32>} : memref<32x256xbf16, #tpu.memory_space<vmem>>, vector<32x128xbf16>,
      %46 = vector.extract_strided_slice %37 {offsets = [40, 0], sizes = [8, 128], strides = [1, 1]} : vector<48x128xf32> to vector<8x128xf32>
      %47 = arith.truncf %46 : vector<8x128xf32> to vector<8x128xbf16>
      %c0_28 = arith.constant 0 : index
      %c0_29 = arith.constant 0 : index
      %48 = vector.load %arg9[%c0_28, %c0_29] : memref<8x256xbf16, #tpu.memory_space<vmem>>, vector<8x128xbf16>
      tpu.vector_store %arg9[%c0_28, %c0_29], %47 {strides = array<i32>} : memref<8x256xbf16, #tpu.memory_space<vmem>>, vector<8x128xbf16>,
      %c0_30 = arith.constant 0 : index
      %c0_31 = arith.constant 0 : index
      %c128 = arith.constant 128 : index
      %49 = vector.load %arg2[%c0_30, %c0_31, %c128] : memref<1x32x256xbf16, #tpu.memory_space<vmem>>, vector<1x32x128xbf16>
      %50 = vector.shape_cast %49 : vector<1x32x128xbf16> to vector<32x128xbf16>
      %c0_32 = arith.constant 0 : index
      %c0_33 = arith.constant 0 : index
      %51 = vector.load %arg3[%c0_32, %c0_33] : memref<48x32xbf16, #tpu.memory_space<vmem>>, vector<48x32xbf16>
      %cst_34 = arith.constant dense<0.000000e+00> : vector<48x128xf32>
      %52 = tpu.matmul %51, %50, %cst_34 {dimension_numbers = #tpu.dot_dimension_numbers<[1], [0], [0], [1], [0, 0, 1, 1], [], []>} : vector<48x32xbf16>, vector<32x128xbf16>, vector<48x128xf32> -> vector<48x128xf32>
      %c0_35 = arith.constant 0 : index
      %c0_36 = arith.constant 0 : index
      %53 = vector.load %arg4[%c0_35, %c0_36] : memref<48x1xf32, #tpu.memory_space<vmem>>, vector<48x1xf32>
      %54 = vector.broadcast %53 : vector<48x1xf32> to vector<48x128xf32>
      %55 = arith.addf %52, %54 : vector<48x128xf32>
      %56 = vector.extract_strided_slice %55 {offsets = [0, 0], sizes = [8, 128], strides = [1, 1]} : vector<48x128xf32> to vector<8x128xf32>
      %57 = arith.truncf %56 : vector<8x128xf32> to vector<8x128xbf16>
      %c0_37 = arith.constant 0 : index
      %c128_38 = arith.constant 128 : index
      %58 = vector.load %arg8[%c0_37, %c128_38] : memref<8x256xbf16, #tpu.memory_space<vmem>>, vector<8x128xbf16>
      tpu.vector_store %arg8[%c0_37, %c128_38], %57 {strides = array<i32>} : memref<8x256xbf16, #tpu.memory_space<vmem>>, vector<8x128xbf16>,
      %59 = vector.extract_strided_slice %55 {offsets = [8, 0], sizes = [32, 128], strides = [1, 1]} : vector<48x128xf32> to vector<32x128xf32>
      %60 = vector.broadcast %30 : f32 to vector<32x128xf32>
      %61 = arith.mulf %60, %59 : vector<32x128xf32>
      %62 = arith.truncf %61 : vector<32x128xf32> to vector<32x128xbf16>
      %c0_39 = arith.constant 0 : index
      %c128_40 = arith.constant 128 : index
      %63 = vector.load %arg10[%c0_39, %c128_40] : memref<32x256xbf16, #tpu.memory_space<vmem>>, vector<32x128xbf16>
      tpu.vector_store %arg10[%c0_39, %c128_40], %62 {strides = array<i32>} : memref<32x256xbf16, #tpu.memory_space<vmem>>, vector<32x128xbf16>,
      %64 = vector.extract_strided_slice %55 {offsets = [40, 0], sizes = [8, 128], strides = [1, 1]} : vector<48x128xf32> to vector<8x128xf32>
      %65 = arith.truncf %64 : vector<8x128xf32> to vector<8x128xbf16>
      %c0_41 = arith.constant 0 : index
      %c128_42 = arith.constant 128 : index
      %66 = vector.load %arg9[%c0_41, %c128_42] : memref<8x256xbf16, #tpu.memory_space<vmem>>, vector<8x128xbf16>
      tpu.vector_store %arg9[%c0_41, %c128_42], %65 {strides = array<i32>} : memref<8x256xbf16, #tpu.memory_space<vmem>>, vector<8x128xbf16>,
    } else {
    }
    %c128_i32 = arith.constant 128 : i32
    %3 = arith.muli %arg1, %c128_i32 : i32
    %4 = tpu.assume_multiple %3, 128 : i32
    %c0 = arith.constant 0 : index
    %5 = arith.index_cast %4 : i32 to index
    %6 = vector.load %arg8[%c0, %5] : memref<8x256xbf16, #tpu.memory_space<vmem>>, vector<8x128xbf16>
    %c0_1 = arith.constant 0 : index
    %c0_2 = arith.constant 0 : index
    %7 = vector.load %arg9[%c0_1, %c0_2] : memref<8x256xbf16, #tpu.memory_space<vmem>>, vector<8x256xbf16>
    %cst = arith.constant dense<0.000000e+00> : vector<128x256xf32>
    %8 = tpu.matmul %6, %7, %cst {dimension_numbers = #tpu.dot_dimension_numbers<[0], [0], [1], [1], [0, 1, 1, 1], [], []>} : vector<8x128xbf16>, vector<8x256xbf16>, vector<128x256xf32> -> vector<128x256xf32>
    %cst_3 = arith.constant dense<0xFF800000> : vector<128xf32>
    %9 = vector.multi_reduction <maximumf>, %8, %cst_3 [1] : vector<128x256xf32> to vector<128xf32>
    %10 = vector.shape_cast %9 : vector<128xf32> to vector<128x1xf32>
    %11 = vector.broadcast %10 : vector<128x1xf32> to vector<128x256xf32>
    %12 = arith.subf %8, %11 : vector<128x256xf32>
    %13 = arith.truncf %12 : vector<128x256xf32> to vector<128x256xbf16>
    %14 = math.exp %13 : vector<128x256xbf16>
    %15 = arith.extf %14 : vector<128x256xbf16> to vector<128x256xf32>
    %cst_4 = arith.constant dense<0.000000e+00> : vector<128xf32>
    %16 = vector.multi_reduction <add>, %15, %cst_4 [1] : vector<128x256xf32> to vector<128xf32>
    %17 = vector.shape_cast %16 : vector<128xf32> to vector<128x1xf32>
    %18 = tpu.reciprocal %17 {approx = true} : vector<128x1xf32> -> vector<128x1xf32>
    %19 = vector.broadcast %18 : vector<128x1xf32> to vector<128x256xf32>
    %20 = arith.mulf %15, %19 : vector<128x256xf32>
    %21 = arith.truncf %20 : vector<128x256xf32> to vector<128x256xbf16>
    %c0_5 = arith.constant 0 : index
    %c0_6 = arith.constant 0 : index
    %22 = vector.load %arg10[%c0_5, %c0_6] : memref<32x256xbf16, #tpu.memory_space<vmem>>, vector<32x256xbf16>
    %cst_7 = arith.constant dense<0.000000e+00> : vector<32x128xf32>
    %23 = tpu.matmul %22, %21, %cst_7 {dimension_numbers = #tpu.dot_dimension_numbers<[1], [1], [0], [0], [0, 0, 1, 0], [], []>} : vector<32x256xbf16>, vector<128x256xbf16>, vector<32x128xf32> -> vector<32x128xf32>
    %c0_8 = arith.constant 0 : index
    %c0_9 = arith.constant 0 : index
    %c0_10 = arith.constant 0 : index
    %24 = vector.load %arg6[%c0_8, %c0_9, %c0_10] : memref<1x32x128xf32, #tpu.memory_space<vmem>>, vector<1x32x128xf32>
    %25 = vector.shape_cast %24 : vector<1x32x128xf32> to vector<32x128xf32>
    %26 = arith.addf %23, %25 : vector<32x128xf32>
    %c0_11 = arith.constant 0 : index
    %c0_12 = arith.constant 0 : index
    %c0_13 = arith.constant 0 : index
    %27 = vector.load %arg7[%c0_11, %c0_12, %c0_13] : memref<1x32x128xf32, #tpu.memory_space<vmem>>, vector<1x32x128xf32>
    %28 = vector.shape_cast %27 : vector<1x32x128xf32> to vector<32x128xf32>
    %29 = vector.shape_cast %26 : vector<32x128xf32> to vector<1x32x128xf32>
    tpu.vector_store %arg7[%c0_11, %c0_12, %c0_13], %29 {strides = array<i32>} : memref<1x32x128xf32, #tpu.memory_space<vmem>>, vector<1x32x128xf32>,
    return
  }
  func.func @transform_0(%arg0: i32, %arg1: i32) -> (i32, i32, i32) {
    %c0_i32 = arith.constant 0 : i32
    %c0_i32_0 = arith.constant 0 : i32
    %c0_i32_1 = arith.constant 0 : i32
    return %arg0, %c0_i32, %c0_i32_0 : i32, i32, i32
  }
  func.func @transform_1(%arg0: i32, %arg1: i32) -> (i32, i32) {
    %c0_i32 = arith.constant 0 : i32
    %c0_i32_0 = arith.constant 0 : i32
    %c0_i32_1 = arith.constant 0 : i32
    return %c0_i32, %c0_i32_0 : i32, i32
  }
  func.func @transform_2(%arg0: i32, %arg1: i32) -> (i32, i32) {
    %c0_i32 = arith.constant 0 : i32
    %c0_i32_0 = arith.constant 0 : i32
    %c0_i32_1 = arith.constant 0 : i32
    return %c0_i32, %c0_i32_0 : i32, i32
  }
  func.func @transform_3(%arg0: i32, %arg1: i32) -> (i32, i32) {
    %c0_i32 = arith.constant 0 : i32
    %c0_i32_0 = arith.constant 0 : i32
    %c0_i32_1 = arith.constant 0 : i32
    return %c0_i32, %c0_i32_0 : i32, i32
  }
  func.func @transform_4(%arg0: i32, %arg1: i32) -> (i32, i32, i32) {
    %c0_i32 = arith.constant 0 : i32
    %c0_i32_0 = arith.constant 0 : i32
    return %arg0, %c0_i32, %arg1 : i32, i32, i32
  }
  func.func @transform_5(%arg0: i32, %arg1: i32) -> (i32, i32, i32) {
    %c0_i32 = arith.constant 0 : i32
    %c0_i32_0 = arith.constant 0 : i32
    return %arg0, %c0_i32, %arg1 : i32, i32, i32
  }
}

</mosaic_0001>

<bundles_post_ra>
// kernel: tpu_custom_call.1
= control target key start
LH: loop header
LB: loop body
LE: loop exit
PB: predicated region body
PF: predicated region fallthrough
CT: control target
= control target key end

     0   :  { %s2281_s0 = inlined_call_operand.vmem [shape: bf16[2,32,256], index: 0, kind: input, shape index: {}]   ;;  %s2282_s1 = inlined_call_operand.vmem [shape: bf16[48,32], index: 1, kind: input, shape index: {}]   ;;  %s2283_s2 = inlined_call_operand.vmem [shape: f32[48,1], index: 2, kind: input, shape index: {}]   ;;  %s2284_s3 = inlined_call_operand.<no memory space> [shape: f32[1,1], index: 3, kind: input, shape index: {}]   ;;  %s2285_s4 = inlined_call_operand.hbm [shape: f32[2,32,256], index: 4, kind: input, shape index: {}]   ;;  %s2286_s5 = inlined_call_operand.hbm [shape: f32[2,32,256], index: 5, kind: output, shape index: {}]  }
   0x1   :  { %10 = sst [smem:[#allocation5]] %s2284_s3 }
   0x2   :  { %11 = vsyncpa [#allocation7], 0 }
   0x3   :  { %13 = vsyncpa [#allocation7 + $0x1], 0 }
   0x4   :  { %14 = vsyncpa [#allocation8], 0 }
   0x5   :  { %16 = vsyncpa [#allocation8 + $0x1], 0  ;;  %s1751_s20 = smov 0   ;;  %s1753_s21 = smov 0  }
   0x6   :  { %s1755_s22 = smov 0   ;;  %s1757_s23 = smov 0  }
   0x7   :  { %s1759_s24 = smov 0   ;;  %s1761_s25 = smov 0  }
   0x8   :  { %s1763_s26 = smov 0   ;;  %s1765_s27 = smov 0  }
   0x9 LB: > { %2290 = sst [smem:[#allocation12_spill]] %s1676_s20  ;;  %s1282_s3 = sadd.s32 4294967295, %s1704_s27   ;;  %s1704_s27 = sphi %s1765_s27, %s22_s27   ;;  %s1700_s26 = sphi %s1763_s26, %s2307_s26   ;;  %s1696_s25 = sphi %s1761_s25, %s2306_s25   ;;  %s1692_s24 = sphi %s1759_s24, %s2305_s24   ;;  %s1688_s23 = sphi %s1757_s23, %s2304_s23   ;;  %s1684_s22 = sphi %s1755_s22, %s2303_s22   ;;  %s1680_s21 = sphi %s1753_s21, %s2302_s21   ;;  %s1676_s20 = sphi %s1751_s20, %s2301_s20  }
   0xa   : > { %s1283_s28 = sadd.s32 4294967294, %s1704_s27   ;;  %s31_s29 = sadd.s32 1, %s1696_s25 }
   0xb   : > { %s34_s30 = sadd.s32 1, %s1700_s26  ;;  %p32_p0 = scmp.ge.s32.totalorder %s31_s29, 2 }
   0xc   : > { %s132_s6 = sadd.s32 1, %s1684_s22  ;;  %p139_p1 = scmp.ne.s32.totalorder %s1684_s22, %s1680_s21 }
   0xd   : > { %p140_p2 = scmp.eq.s32.totalorder %s1704_s27, 0  ;;  %s2309_s29 = smov (%p32_p0, %s31_s29), 0 }
   0xe   : > { %2291 = sst [smem:[#allocation13_spill]] %s2309_s29  ;;  %s2311_s30 = smov (!%p32_p0, %s34_s30), %s1700_s26 }
   0xf   : > { %s128_s7 = ssub.s32 %s1696_s25, %s2309_s29  ;;  %p1804_p3 = por %p140_p2, %p139_p1 }
  0x10   : > { %p36_p4 = scmp.ge.s32.totalorder %s2311_s30, 2  ;;  %p145_p5 = scmp.ne.s32.totalorder %s1680_s21, %s1676_s20 }
  0x11   : > { %p146_p6 = scmp.eq.s32.totalorder %s1282_s3, 0  ;;  %p171_p7 = scmp.eq.s32.totalorder %s1282_s3, 3 }
  0x12   : > { %s2313_s30 = smov (%p36_p4, %s2311_s30), 0  ;;  %p177_p10 = scmp.eq.s32.totalorder %s1283_s28, 3 }
  0x13   : > { %2293 = sst [smem:[#allocation14_spill]] %s2313_s30  ;;  %p1812_p8 = por %p146_p6, %p145_p5 }
  0x14   : > { %p1816_p9 = por %p171_p7, %p139_p1  ;;  %s127_s11 = ssub.s32 %s1700_s26, %s2313_s30 }
  0x15   : > { %s129_s12 = sor.u32 %s128_s7, %s127_s11  ;;  %p1822_p12 = por %p177_p10, %p145_p5 }
  0x16   : > { %p130_p11 = scmp.eq.s32.totalorder %s129_s12, 0  ;;  %p1420_p13 = scmp.lt.s32.totalorder %s1704_s27, 4 }
  0x17   : > { %s214_s14 = sand.u32 1, %s1684_s22   ;;  %s1287_s17 = sshll.u32 %s1700_s26, 3 }
  0x18   : > { %s1829_s15 = scalar_select %p130_p11, %s1684_s22, %s132_s6  }
  0x19   : > { %s1286_s16 = sshll.u32 %s214_s14, 5  ;;  %s223_s18 = sadd.s32 %s1696_s25, %s1287_s17 }
  0x1a   : > { %s218_s19 = scalar_lea.vmem [#allocation6], %s1286_s16  ;;  %s1288_s29 = sshll.u32 %s223_s18, 7 }
  0x1b   : > { %s226_s3 = sshll.u32 %s218_s19, 4  ;;  %s225_s28 = scalar_lea.hbm %s2285_s4, %s1288_s29  ;;  %s227_s3 = int_to_ptr.vmem [resolvable:$true] %s226_s3 }
  0x1c   : > { %p1838_p0 = pnand %p1420_p13, %p1804_p3  ;;  %s215_s11 = scalar_lea.sflag [#allocation7], %s214_s14 }
  0x1d   : > { %s1593_s6 = scalar_lea.vmem %s227_s3, 512  ;;  %s1706_s12 = smov [#allocation6]  }
  0x1e   : > { %p1582_p1 = pneg %p1838_p0  ;;  %p1594_p2 = scmp.ne.s32.totalorder %s227_s3, %s1593_s6 }
  0x1f   : > { %s1598_s16 = sshll.u32 %s1706_s12, 4  ;;  %s1599_s16 = int_to_ptr.vmem [resolvable:$false] %s1598_s16 }
  0x20   : > { %p1596_p4 = pnand %p1594_p2, %p1582_p1  ;;  %s1600_s17 = scalar_lea.vmem %s1599_s16, 1024 }
  0x21   : > { %p1601_p6 = scmp.lt.s32.totalorder %s227_s3, %s1599_s16  ;;  %p1602_p7 = scmp.lt.s32.totalorder %s1600_s17, %s1593_s6 }
  0x22   : > { %p1597_p5 = pneg %p1596_p4 }
  0x23   : > { %p1603_p10 = por %p1602_p7, %p1601_p6 }
  0x25   : > { %p1604_p11 = pnand %p1603_p10, %p1597_p5 }
  0x27   : > { %1607 = shalt.err (!%p1604_p11)
}
  0x28   : > { %s1707_s20 = smov 256   ;;  %s1708_s29 = smov 128  }
  0x29   : > { %s1709_s30 = smov 8   ;;  %p1289_p3 = scmp.ge.s32.totalorder %s1704_s27, 1 }
  0x2a   : > { %1415 = dma.hbm_to_vmem [thread:$0]  (!%p1838_p0), %s225_s28, 512, %s227_s3, %s215_s11, %s1707_s20, %s1708_s29, %s1709_s30  }
  0x2b   : > { %p234_p13 = scmp.lt.s32.totalorder %s1704_s27, 5 }
  0x2d   : > { %p235_p1 = pnand %p1289_p3, %p234_p13 }
  0x2e   : > { %s1849_s8 = sand.u32 (!%p235_p1), 1, %s1680_s21  }
  0x2f   : > { %238 = sbr.rel (%p235_p1) target bundleno = 1250 (0x4e2), region = 40  ;;  %s1290_s14 = sshll.u32 (!%p235_p1), %s1849_s8, 5 }
  0x30   : > { %s241_s18 = scalar_lea.sflag (!%p235_p1), [#allocation7], %s1849_s8  ;;  %s1853_s19 = scalar_lea.vmem (!%p235_p1), [#allocation6], %s1290_s14 }
  0x34   : > { %1667 = dma.done.wait (%p1812_p8), %s241_s18, 512  }
  0x35   : > { %1669 = vsyncadd (%p1812_p8), %s241_s18, 4294966784  ;;  %p276_p0 = scmp.lt.s32.totalorder %s1692_s24, 1  ;;  %s1864_s12 = scalar_lea.vmem [#allocation9], %s1290_s14 }
  0x36   : > { %p1294_p2 = scmp.ne.s32.totalorder %s1688_s23, 0 }
  0x37   : > { %s277_s3 = scalar_select %p276_p0, %s1692_s24, 1 }
  0x38   : > { %285 = sbr.rel (%p1294_p2) target bundleno = 289 (0x121), region = 48  ;;  %s286_s11 = sld [smem:[#allocation5]] (!%p1294_p2) }
  0x39   : > { %s1341_s28 = sshll.u32 %s277_s3, 5 }
  0x3a   : > { %s280_s6 = scalar_lea.vmem %s2281_s0, %s1341_s28 }
  0x3d   : > { %v1710_v0 = vmov 0.0   ;;  %v1498_v1 = vld [vmem:[%s280_s6 + $0x10] ss:$8 sps:$4 sm:$0xff]   ;;  %v1499_v2 = vld [vmem:[%s280_s6 + $0x14] ss:$8 sps:$4 sm:$0xff]   ;;  %vm1711_vm0 = vmmov 0  }
  0x3e   : > { %1360 = vmatprep.subr.bf16.mxu0 %v1710_v0  ;;  %1376 = vmatprep.subr.bf16.mxu1 %v1710_v0  ;;  %v1500_v3 = vld [vmem:[%s280_s6] ss:$8 sps:$4 sm:$0xff]   ;;  %v1501_v4 = vld [vmem:[%s280_s6 + $0x4] ss:$8 sps:$4 sm:$0xff]   ;;  %vm360_vm1 = vcmask 261120   ;;  %v1712_v7 = vmov 0   ;;  %v429_v36 = vstv %s286_s11 }
  0x3f   : > { %1364 = vmatprep.mubr.msk.bf16.mxu0 %vm1711_vm0, %v1710_v0  ;;  %1380 = vmatprep.mubr.msk.bf16.mxu1 %vm1711_vm0, %v1710_v0  ;;  %v1502_v5 = vld [vmem:[%s2282_s1] sm:$0xff]   ;;  %v300_v8 = vld [vmem:[%s2283_s2 + $0x18] sm:$0xff]  ;;  %v298_v9 = vld [vmem:[%s2283_s2 + $0x8] sm:$0xff] }
  0x40   : > { %1361 = vmatpush3.bf16.msra.mxu0 %v1498_v1  ;;  %1377 = vmatpush3.bf16.msra.mxu1 %v1499_v2  ;;  %v1503_v6 = vld [vmem:[%s2282_s1] sm:$0xff]   ;;  %v1504_v11 = vld [vmem:[%s2282_s1 + $0x8] sm:$0xff]   ;;  %v299_v12 = vld [vmem:[%s2283_s2 + $0x10] sm:$0xff] }
  0x41   : > { %1362 = vmatprep.subr.bf16.mxu0 %v1710_v0  ;;  %1378 = vmatprep.subr.bf16.mxu1 %v1710_v0  ;;  %v301_v10 = vld [vmem:[%s2283_s2 + $0x20] sm:$0xff]  ;;  %v1505_v13 = vld [vmem:[%s2282_s1 + $0x8] sm:$0xff]   ;;  %v1506_v14 = vld [vmem:[%s2282_s1 + $0x10] sm:$0xff]  }
  0x42   : > { %1497 = vset.pattern.permute.xlu1 %v1712_v7  ;;  %1496 = vset.pattern.permute.xlu0 %v1712_v7  ;;  %v1507_v15 = vld [vmem:[%s2282_s1 + $0x10] sm:$0xff]   ;;  %v302_v16 = vld [vmem:[%s2283_s2 + $0x28] sm:$0xff]  ;;  %v297_v17 = vld [vmem:[%s2283_s2] sm:$0xff] }
  0x43   : > { %320 = vperm.xlu1 %1497, %v300_v8   ;;  %310 = vperm.xlu0 %1496, %v298_v9  }
  0x44   : > { %1363 = vmatpush3.bf16.msra.mxu0 %v1500_v3  ;;  %1379 = vmatpush3.bf16.msra.mxu1 %v1501_v4 }
  0x47   : > { %1365 = vmatmul.mubr.msk.bf16.vlgmr.msra.gmra.mxu0 %vm360_vm1, %v1502_v5  ;;  %1381 = vmatmul.mubr.msk.bf16.vlgmr.msra.gmra.mxu1 %vm360_vm1, %v1503_v6 }
  0x48   : > { %1368 = vmatprep.mubr.msk.bf16.mxu0 %vm1711_vm0, %v1710_v0  ;;  %1384 = vmatprep.mubr.msk.bf16.mxu1 %vm1711_vm0, %v1710_v0 }
  0x49   : > { %325 = vperm.xlu1 %1497, %v301_v10   ;;  %315 = vperm.xlu0 %1496, %v299_v12  }
  0x4d   : > { %484 = vperm.xlu1 %1497, %v299_v12   ;;  %479 = vperm.xlu0 %1496, %v298_v9  }
  0x4f   : > { %1369 = vmatmul.mubr.msk.bf16.gmra.mxu0 %vm360_vm1, %v1504_v11  ;;  %1385 = vmatmul.mubr.msk.bf16.gmra.mxu1 %vm360_vm1, %v1505_v13 }
  0x50   : > { %1372 = vmatprep.mubr.msk.bf16.mxu0 %vm1711_vm0, %v1710_v0  ;;  %1388 = vmatprep.mubr.msk.bf16.mxu1 %vm1711_vm0, %v1710_v0 }
  0x51   : > { %494 = vperm.xlu1 %1497, %v301_v10   ;;  %489 = vperm.xlu0 %1496, %v300_v8  }
  0x55   : > { %330 = vperm.xlu1 %1497, %v302_v16   ;;  %305 = vperm.xlu0 %1496, %v297_v17  }
  0x57   : > { %1373 = vmatmul.mubr.msk.bf16.gmra.mxu0 %vm360_vm1, %v1506_v14  ;;  %1389 = vmatmul.mubr.msk.bf16.gmra.mxu1 %vm360_vm1, %v1507_v15 }
  0x59   : > { %499 = vperm.xlu1 %1497, %v302_v16   ;;  %474 = vperm.xlu0 %1496, %v297_v17  }
  0xbe   : > { %v311_v18 = vpop.permute.xlu0 %310  ;;  %v321_v22 = vpop.permute.xlu1 %320 }
  0xc4   : > { %v316_v19 = vpop.permute.xlu0 %315  ;;  %v326_v24 = vpop.permute.xlu1 %325 }
  0xc8   : > { %v480_v20 = vpop.permute.xlu0 %479  ;;  %v485_v31 = vpop.permute.xlu1 %484 }
  0xcc   : > { %v490_v21 = vpop.permute.xlu0 %489  ;;  %v495_v45 = vpop.permute.xlu1 %494 }
  0xd0   : > { %v306_v23 = vpop.permute.xlu0 %305  ;;  %v331_v62 = vpop.permute.xlu1 %330 }
  0xd4   : > { %v475_v25 = vpop.permute.xlu0 %474  ;;  %v500_v13 = vpop.permute.xlu1 %499 }
 0x107   : > { %v404_v26 = vpop.f32.mrf.mxu0  ;;  %v572_v27 = vpop.f32.mrf.mxu1 }
 0x108   : > { %v405_v28 = vadd.f32 %v404_v26, %v306_v23  ;;  %v573_v29 = vadd.f32 %v572_v27, %v475_v25 }
 0x109   : > { %v1366_v30 = vpop.f32.mrf.mxu0  ;;  %v1382_v33 = vpop.f32.mrf.mxu1 }
 0x10a   : > { %v427_v32 = vpack.c.bf16 %v405_v28, %v405_v28  ;;  %v595_v34 = vpack.c.bf16 %v573_v29, %v573_v29 }
 0x10b   : > { %v407_v35 = vpop.f32.mrf.mxu0  ;;  %v575_v38 = vpop.f32.mrf.mxu1 }
 0x10c   : > { %428 = vst [vmem:[#allocation2] sm:$0xf] %v427_v32  ;;  %v408_v37 = vadd.f32 %v407_v35, %v311_v18  ;;  %596 = vst [vmem:[#allocation2 + $0x4] sm:$0xf] %v595_v34  ;;  %v576_v39 = vadd.f32 %v575_v38, %v480_v20 }
 0x10d   : > { %v1367_v40 = vpop.f32.mrf.mxu0  ;;  %v1383_v42 = vpop.f32.mrf.mxu1 }
 0x10e   : > { %v430_v41 = vmul.f32 %v429_v36, %v408_v37  ;;  %v597_v43 = vmul.f32 %v576_v39, %v429_v36 }
 0x10f   : > { %v412_v44 = vpop.f32.mrf.mxu0  ;;  %v580_v48 = vpop.f32.mrf.mxu1 }
 0x110   : > { %v1342_v46 = vpack.c.bf16 %v430_v41, %v430_v41  ;;  %v413_v47 = vadd.f32 %v412_v44, %v316_v19  ;;  %v1346_v49 = vpack.c.bf16 %v597_v43, %v597_v43  ;;  %v581_v50 = vadd.f32 %v580_v48, %v485_v31 }
 0x111   : > { %v1370_v51 = vpop.f32.mrf.mxu0  ;;  %v1386_v53 = vpop.f32.mrf.mxu1 }
 0x112   : > { %450 = vst [vmem:[#allocation4] sm:$0xf] %v1342_v46  ;;  %v431_v52 = vmul.f32 %v429_v36, %v413_v47  ;;  %617 = vst [vmem:[#allocation4 + $0x4] sm:$0xf] %v1346_v49  ;;  %v598_v54 = vmul.f32 %v581_v50, %v429_v36 }
 0x113   : > { %v415_v55 = vpop.f32.mrf.mxu0  ;;  %v583_v58 = vpop.f32.mrf.mxu1 }
 0x114   : > { %v1343_v56 = vpack.c.bf16 %v431_v52, %v431_v52  ;;  %v416_v57 = vadd.f32 %v415_v55, %v321_v22  ;;  %v1347_v59 = vpack.c.bf16 %v598_v54, %v598_v54  ;;  %v584_v60 = vadd.f32 %v583_v58, %v490_v21 }
 0x115   : > { %v1371_v61 = vpop.f32.mrf.mxu0  ;;  %v1387_v0 = vpop.f32.mrf.mxu1 }
 0x116   : > { %451 = vst [vmem:[#allocation4 + $0x8] sm:$0xf] %v1343_v56  ;;  %v432_v63 = vmul.f32 %v429_v36, %v416_v57  ;;  %618 = vst [vmem:[#allocation4 + $0xc] sm:$0xf] %v1347_v59  ;;  %v599_v1 = vmul.f32 %v584_v60, %v429_v36 }
 0x117   : > { %v420_v2 = vpop.f32.mrf.mxu0  ;;  %v588_v5 = vpop.f32.mrf.mxu1 }
 0x118   : > { %v1344_v3 = vpack.c.bf16 %v432_v63, %v432_v63  ;;  %v421_v4 = vadd.f32 %v420_v2, %v326_v24  ;;  %v1348_v6 = vpack.c.bf16 %v599_v1, %v599_v1  ;;  %v589_v7 = vadd.f32 %v588_v5, %v495_v45 }
 0x119   : > { %v1374_v8 = vpop.f32.mrf.mxu0  ;;  %v1390_v10 = vpop.f32.mrf.mxu1 }
 0x11a   : > { %452 = vst [vmem:[#allocation4 + $0x10] sm:$0xf] %v1344_v3  ;;  %v433_v9 = vmul.f32 %v429_v36, %v421_v4  ;;  %619 = vst [vmem:[#allocation4 + $0x14] sm:$0xf] %v1348_v6  ;;  %v600_v11 = vmul.f32 %v589_v7, %v429_v36 }
 0x11b   : > { %v423_v12 = vpop.f32.mrf.mxu0  ;;  %v591_v16 = vpop.f32.mrf.mxu1 }
 0x11c   : > { %v1345_v14 = vpack.c.bf16 %v433_v9, %v433_v9  ;;  %v424_v15 = vadd.f32 %v423_v12, %v331_v62  ;;  %v1349_v17 = vpack.c.bf16 %v600_v11, %v600_v11  ;;  %v592_v18 = vadd.f32 %v591_v16, %v500_v13 }
 0x11d   : > { %v1375_v19 = vpop.f32.mrf.mxu0  ;;  %v1391_v21 = vpop.f32.mrf.mxu1 }
 0x11e   : > { %453 = vst [vmem:[#allocation4 + $0x18] sm:$0xf] %v1345_v14  ;;  %v454_v20 = vpack.c.bf16 %v424_v15, %v424_v15  ;;  %620 = vst [vmem:[#allocation4 + $0x1c] sm:$0xf] %v1349_v17  ;;  %v621_v22 = vpack.c.bf16 %v592_v18, %v592_v18 }
 0x120   : > { %455 = vst [vmem:[#allocation3] sm:$0xf] %v454_v20  ;;  %622 = vst [vmem:[#allocation3 + $0x4] sm:$0xf] %v621_v22 }
 0x121 PF: > { %s1319_s6 = sshll.u32 %s1688_s23, 7  ;;  %vm676_vm2 = vcmask 1043456   ;;  %v1713_v26 = vmov 0   ;;  %vm651_vm3 = vcmask 64512   ;;  %s1337_s20 = sshll.u32 %s1692_s24, 3 }
 0x122   : > { %s624_s9 = sshra.s32 %s1319_s6, 7  ;;  %715 = vmatprep.mubr.bf16.mxu0 %v1713_v26  ;;  %s1177_s29 = sadd.s32 %s1688_s23, %s1337_s20 }
 0x123   : > { %s1320_s16 = sshll.u32 %s624_s9, 2  ;;  %s1338_s30 = sshll.u32 %s1177_s29, 7 }
 0x124   : > { %s627_s17 = scalar_lea.vmem [#allocation2], %s1320_s16  ;;  %s1180_s14 = sshll.u32 %s1864_s12, 4  ;;  %s2226_s14 = int_to_ptr.vmem [resolvable:$true] %s1180_s14 }
 0x125   : > { %v628_v28 = vld [vmem:[%s627_s17] sm:$0xf]  ;;  %s2224_s18 = scalar_lea.hbm %s2286_s5, %s1338_s30  ;;  %s1608_s3 = scalar_lea.vmem %s2226_s14, 512 }
 0x126   : > { %630 = vxpose.xlu0.c.b16.start.end [1/1] (short) %v628_v28, 128  ;;  %p1609_p8 = scmp.ne.s32.totalorder %s2226_s14, %s1608_s3  ;;  %s1714_s28 = smov [#allocation9]  }
 0x127   : > { %v629_v23 = vld [vmem:[#allocation3] sm:$0xff]  ;;  %s1612_s7 = sshll.u32 %s1714_s28, 4  ;;  %s1613_s7 = int_to_ptr.vmem [resolvable:$false] %s1612_s7 }
 0x128   : > { %v1322_v24 = vcombine.high %v629_v23, %v629_v23  ;;  %v1321_v25 = vcombine.low %v629_v23, %v629_v23  ;;  %p1610_p4 = pnand %p1609_p8, %p1816_p9  ;;  %s1614_s11 = scalar_lea.vmem %s1613_s7, 1024 }
 0x129   : > { %p1615_p6 = scmp.lt.s32.totalorder %s2226_s14, %s1613_s7  ;;  %p1616_p7 = scmp.lt.s32.totalorder %s1614_s11, %s1608_s3 }
 0x12a   : > { %1323 = vmatprep.subr.msk.bf16.mxu0 %vm676_vm2, %v1322_v24  ;;  %v678_v27 = vsel %vm676_vm2, %v1321_v25, 0  ;;  %p1611_p5 = pneg %p1610_p4 }
 0x12b   : > { %698 = vmatpush1.bf16.msra.mxu0 %v678_v27  ;;  %p1617_p10 = por %p1616_p7, %p1615_p6 }
 0x12d   : > { %p1618_p11 = pnand %p1617_p10, %p1611_p5 }
 0x188   : > { %v638_v29 = vpop.trf.xlu0 }
 0x189   : > { %1324 = vmatmul.mubr.msk.bf16.vlgmr.msra.gmra.mxu0 %vm651_vm3, %v638_v29 }
 0x18a   : > { %725 = vmatprep.mubr.bf16.mxu0 %v1713_v26 }
 0x18c   : > { %v639_v30 = vpop.trf.xlu0 }
 0x190   : > { %v640_v31 = vpop.trf.xlu0 }
 0x191   : > { %1325 = vmatmul.mubr.msk.bf16.gmra.mxu0 %vm651_vm3, %v639_v30 }
 0x192   : > { %735 = vmatprep.mubr.bf16.mxu0 %v1713_v26 }
 0x194   : > { %v641_v32 = vpop.trf.xlu0 }
 0x198   : > { %v642_v33 = vpop.trf.xlu0 }
 0x199   : > { %1326 = vmatmul.mubr.msk.bf16.gmra.mxu0 %vm651_vm3, %v640_v31 }
 0x19a   : > { %745 = vmatprep.mubr.bf16.mxu0 %v1713_v26 }
 0x19c   : > { %v643_v34 = vpop.trf.xlu0 }
 0x1a0   : > { %v644_v35 = vpop.trf.xlu0 }
 0x1a1   : > { %1327 = vmatmul.mubr.msk.bf16.gmra.mxu0 %vm651_vm3, %v641_v32 }
 0x1a2   : > { %755 = vmatprep.mubr.bf16.mxu0 %v1713_v26 }
 0x1a4   : > { %v645_v36 = vpop.trf.xlu0 }
 0x1a9   : > { %1328 = vmatmul.mubr.msk.bf16.gmra.mxu0 %vm651_vm3, %v642_v33 }
 0x1aa   : > { %765 = vmatprep.mubr.bf16.mxu0 %v1713_v26 }
 0x1b1   : > { %1329 = vmatmul.mubr.msk.bf16.gmra.mxu0 %vm651_vm3, %v643_v34 }
 0x1b2   : > { %775 = vmatprep.mubr.bf16.mxu0 %v1713_v26 }
 0x1b9   : > { %1330 = vmatmul.mubr.msk.bf16.gmra.mxu0 %vm651_vm3, %v644_v35 }
 0x1ba   : > { %785 = vmatprep.mubr.bf16.mxu0 %v1713_v26 }
 0x1c1   : > { %1331 = vmatmul.mubr.msk.bf16.gmra.mxu0 %vm651_vm3, %v645_v36 }
 0x249   : > { %v1924_v37 = vpop.f32.mrf.mxu0 }
 0x24b   : > { %v1926_v38 = vpop.f32.mrf.mxu0 }
 0x24c   : > { %v796_v20 = vmax.f32 %v1924_v37, %v1926_v38 }
 0x24d   : > { %v1928_v39 = vpop.f32.mrf.mxu0 }
 0x24f   : > { %v1930_v40 = vpop.f32.mrf.mxu0 }
 0x250   : > { %v799_v8 = vmax.f32 %v1928_v39, %v1930_v40 }
 0x251   : > { %v1932_v41 = vpop.f32.mrf.mxu0 }
 0x253   : > { %v1934_v42 = vpop.f32.mrf.mxu0 }
 0x254   : > { %v802_v19 = vmax.f32 %v1932_v41, %v1934_v42 }
 0x255   : > { %v1936_v43 = vpop.f32.mrf.mxu0 }
 0x257   : > { %v1938_v44 = vpop.f32.mrf.mxu0 }
 0x258   : > { %v805_v6 = vmax.f32 %v1936_v43, %v1938_v44 }
 0x259   : > { %v1940_v45 = vpop.f32.mrf.mxu0 }
 0x25b   : > { %v1942_v46 = vpop.f32.mrf.mxu0 }
 0x25c   : > { %v808_v17 = vmax.f32 %v1940_v45, %v1942_v46 }
 0x25d   : > { %v1944_v47 = vpop.f32.mrf.mxu0 }
 0x25f   : > { %v1946_v48 = vpop.f32.mrf.mxu0 }
 0x260   : > { %v811_v18 = vmax.f32 %v1944_v47, %v1946_v48 }
 0x261   : > { %v1948_v49 = vpop.f32.mrf.mxu0 }
 0x263   : > { %v1950_v50 = vpop.f32.mrf.mxu0 }
 0x264   : > { %v814_v15 = vmax.f32 %v1948_v49, %v1950_v50 }
 0x265   : > { %v1952_v51 = vpop.f32.mrf.mxu0 }
 0x267   : > { %v1954_v52 = vpop.f32.mrf.mxu0 }
 0x268   : > { %v817_v16 = vmax.f32 %v1952_v51, %v1954_v52 }
 0x269   : > { %v1956_v53 = vpop.f32.mrf.mxu0 }
 0x26b   : > { %v1958_v54 = vpop.f32.mrf.mxu0 }
 0x26c   : > { %v820_v13 = vmax.f32 %v1956_v53, %v1958_v54 }
 0x26d   : > { %v1960_v55 = vpop.f32.mrf.mxu0 }
 0x26f   : > { %v1962_v56 = vpop.f32.mrf.mxu0 }
 0x270   : > { %v823_v14 = vmax.f32 %v1960_v55, %v1962_v56 }
 0x271   : > { %v1964_v57 = vpop.f32.mrf.mxu0 }
 0x273   : > { %v1966_v58 = vpop.f32.mrf.mxu0 }
 0x274   : > { %v826_v11 = vmax.f32 %v1964_v57, %v1966_v58 }
 0x275   : > { %v1968_v59 = vpop.f32.mrf.mxu0 }
 0x277   : > { %v1970_v60 = vpop.f32.mrf.mxu0 }
 0x278   : > { %v829_v12 = vmax.f32 %v1968_v59, %v1970_v60 }
 0x279   : > { %v777_v61 = vpop.f32.mrf.mxu0 }
 0x27b   : > { %v779_v62 = vpop.f32.mrf.mxu0 }
 0x27c   : > { %v832_v9 = vmax.f32 %v777_v61, %v779_v62 }
 0x27d   : > { %v781_v63 = vpop.f32.mrf.mxu0 }
 0x27f   : > { %v783_v0 = vpop.f32.mrf.mxu0 }
 0x280   : > { %v835_v10 = vmax.f32 %v781_v63, %v783_v0 }
 0x281   : > { %v787_v1 = vpop.f32.mrf.mxu0 }
 0x283   : > { %v789_v2 = vpop.f32.mrf.mxu0 }
 0x284   : > { %v838_v3 = vmax.f32 %v787_v1, %v789_v2 }
 0x285   : > { %v791_v4 = vpop.f32.mrf.mxu0 }
 0x286   : > { %839 = vmax.xlane.f32.xlu0 %v838_v3 }
 0x287   : > { %v793_v5 = vpop.f32.mrf.mxu0 }
 0x288   : > { %v841_v7 = vmax.f32 %v791_v4, %v793_v5 }
 0x28a   : > { %806 = vmax.xlane.f32.xlu0 %v805_v6  ;;  %842 = vmax.xlane.f32.xlu1 %v841_v7 }
 0x28e   : > { %800 = vmax.xlane.f32.xlu0 %v799_v8  ;;  %833 = vmax.xlane.f32.xlu1 %v832_v9 }
 0x292   : > { %836 = vmax.xlane.f32.xlu1 %v835_v10 }
 0x296   : > { %827 = vmax.xlane.f32.xlu1 %v826_v11 }
 0x29a   : > { %830 = vmax.xlane.f32.xlu1 %v829_v12 }
 0x29e   : > { %821 = vmax.xlane.f32.xlu1 %v820_v13 }
 0x2a2   : > { %824 = vmax.xlane.f32.xlu1 %v823_v14 }
 0x2a6   : > { %815 = vmax.xlane.f32.xlu1 %v814_v15 }
 0x2aa   : > { %818 = vmax.xlane.f32.xlu1 %v817_v16 }
 0x2ae   : > { %809 = vmax.xlane.f32.xlu1 %v808_v17 }
 0x2b2   : > { %812 = vmax.xlane.f32.xlu1 %v811_v18 }
 0x2b6   : > { %803 = vmax.xlane.f32.xlu1 %v802_v19 }
 0x2ba   : > { %797 = vmax.xlane.f32.xlu1 %v796_v20 }
 0x30f   : > { %v840_v21 = vpop.xlane.xlu0 %839 }
 0x310   : > { %v872_v23 = vsub.f32 %v787_v1, %v840_v21  ;;  %v873_v24 = vsub.f32 %v789_v2, %v840_v21 }
 0x313   : > { %v843_v22 = vpop.xlane.xlu1 %842 }
 0x314   : > { %v874_v25 = vsub.f32 %v791_v4, %v843_v22  ;;  %v875_v26 = vsub.f32 %v793_v5, %v843_v22 }
 0x316   : > { %v890_v27 = vpack.c.bf16 %v874_v25, %v872_v23  ;;  %v891_v28 = vpack.c.bf16 %v875_v26, %v873_v24 }
 0x317   : > { %v834_v29 = vpop.xlane.xlu1 %833 }
 0x318   : > { %v935_v30 = vmul.bf16 1069105081, %v890_v27  ;;  %v938_v31 = vmul.bf16 1069105081, %v891_v28  ;;  %v868_v33 = vsub.f32 %v777_v61, %v834_v29  ;;  %v869_v34 = vsub.f32 %v779_v62, %v834_v29 }
 0x31a   : > { %1516 = vpow.bf16 %v935_v30 }
 0x31b   : > { %1518 = vpow.bf16 %v938_v31  ;;  %v837_v32 = vpop.xlane.xlu1 %836 }
 0x31c   : > { %v870_v35 = vsub.f32 %v781_v63, %v837_v32  ;;  %v871_v36 = vsub.f32 %v783_v0, %v837_v32 }
 0x31e   : > { %v888_v3 = vpack.c.bf16 %v870_v35, %v868_v33  ;;  %v889_v6 = vpack.c.bf16 %v871_v36, %v869_v34 }
 0x31f   : > { %v828_v7 = vpop.xlane.xlu1 %827 }
 0x320   : > { %v929_v8 = vmul.bf16 1069105081, %v888_v3  ;;  %v932_v1 = vmul.bf16 1069105081, %v889_v6  ;;  %v864_v4 = vsub.f32 %v1964_v57, %v828_v7  ;;  %v865_v5 = vsub.f32 %v1966_v58, %v828_v7 }
 0x322   : > { %1520 = vpow.bf16 %v929_v8  ;;  %v807_v8 = vpop.xlane.xlu0 %806 }
 0x323   : > { %1522 = vpow.bf16 %v932_v1  ;;  %v831_v2 = vpop.xlane.xlu1 %830 }
 0x324   : > { %v866_v9 = vsub.f32 %v1968_v59, %v831_v2  ;;  %v867_v10 = vsub.f32 %v1970_v60, %v831_v2 }
 0x326   : > { %v886_v61 = vpack.c.bf16 %v866_v9, %v864_v4  ;;  %v887_v62 = vpack.c.bf16 %v867_v10, %v865_v5 }
 0x327   : > { %v822_v63 = vpop.xlane.xlu1 %821 }
 0x328   : > { %v2000_v0 = vpop.eup %1516  ;;  %v923_v11 = vmul.bf16 1069105081, %v886_v61  ;;  %v926_v12 = vmul.bf16 1069105081, %v887_v62  ;;  %v860_v59 = vsub.f32 %v1956_v53, %v822_v63  ;;  %v861_v60 = vsub.f32 %v1958_v54, %v822_v63 }
 0x329   : > { %v2002_v13 = vpop.eup %1518  ;;  %v970_v14 = vunpack.c.h.bf16 %v2000_v0  ;;  %v968_v15 = vunpack.c.l.bf16 %v2000_v0 }
 0x32a   : > { %1524 = vpow.bf16 %v923_v11  ;;  %v971_v57 = vunpack.c.h.bf16 %v2002_v13  ;;  %v969_v58 = vunpack.c.l.bf16 %v2002_v13 }
 0x32b   : > { %1526 = vpow.bf16 %v926_v12  ;;  %v825_v16 = vpop.xlane.xlu1 %824 }
 0x32c   : > { %v862_v17 = vsub.f32 %v1960_v55, %v825_v16  ;;  %v863_v18 = vsub.f32 %v1962_v56, %v825_v16  ;;  %v1017_v19 = vadd.f32 %v971_v57, %v970_v14  ;;  %v1014_v20 = vadd.f32 %v969_v58, %v968_v15 }
 0x32e   : > { %v884_v21 = vpack.c.bf16 %v862_v17, %v860_v59  ;;  %v885_v22 = vpack.c.bf16 %v863_v18, %v861_v60  ;;  %1018 = vadd.xlane.f32.xlu0 %v1017_v19  ;;  %1015 = vadd.xlane.f32.xlu1 %v1014_v20  ;;  %v801_v59 = vpop.xlane.xlu0 %800 }
 0x32f   : > { %v816_v53 = vpop.xlane.xlu1 %815 }
 0x330   : > { %v2020_v54 = vpop.eup %1520  ;;  %v917_v55 = vmul.bf16 1069105081, %v884_v21  ;;  %v920_v23 = vmul.bf16 1069105081, %v885_v22  ;;  %v856_v28 = vsub.f32 %v1948_v49, %v816_v53  ;;  %v857_v29 = vsub.f32 %v1950_v50, %v816_v53 }
 0x331   : > { %v2022_v56 = vpop.eup %1522  ;;  %v966_v24 = vunpack.c.h.bf16 %v2020_v54  ;;  %v964_v25 = vunpack.c.l.bf16 %v2020_v54  ;;  %v846_v53 = vsub.f32 %v1928_v39, %v801_v59 }
 0x332   : > { %1528 = vpow.bf16 %v917_v55  ;;  %v967_v26 = vunpack.c.h.bf16 %v2022_v56  ;;  %v965_v27 = vunpack.c.l.bf16 %v2022_v56  ;;  %v847_v55 = vsub.f32 %v1930_v40, %v801_v59 }
 0x333   : > { %1530 = vpow.bf16 %v920_v23  ;;  %v819_v30 = vpop.xlane.xlu1 %818 }
 0x334   : > { %v858_v31 = vsub.f32 %v1952_v51, %v819_v30  ;;  %v859_v32 = vsub.f32 %v1954_v52, %v819_v30  ;;  %v1011_v33 = vadd.f32 %v967_v26, %v966_v24  ;;  %v1008_v34 = vadd.f32 %v965_v27, %v964_v25 }
 0x336   : > { %v882_v35 = vpack.c.bf16 %v858_v31, %v856_v28  ;;  %v883_v36 = vpack.c.bf16 %v859_v32, %v857_v29  ;;  %1012 = vadd.xlane.f32.xlu0 %v1011_v33  ;;  %1009 = vadd.xlane.f32.xlu1 %v1008_v34 }
 0x337   : > { %v810_v49 = vpop.xlane.xlu1 %809 }
 0x338   : > { %v2040_v50 = vpop.eup %1524  ;;  %v911_v51 = vmul.bf16 1069105081, %v882_v35  ;;  %v914_v3 = vmul.bf16 1069105081, %v883_v36  ;;  %v852_v4 = vsub.f32 %v1940_v45, %v810_v49  ;;  %v853_v5 = vsub.f32 %v1942_v46, %v810_v49 }
 0x339   : > { %v2042_v52 = vpop.eup %1526  ;;  %v962_v6 = vunpack.c.h.bf16 %v2040_v50  ;;  %v960_v7 = vunpack.c.l.bf16 %v2040_v50  ;;  %v850_v45 = vsub.f32 %v1936_v43, %v807_v8  ;;  %v851_v46 = vsub.f32 %v1938_v44, %v807_v8 }
 0x33a   : > { %1532 = vpow.bf16 %v911_v51  ;;  %v963_v1 = vunpack.c.h.bf16 %v2042_v52  ;;  %v961_v2 = vunpack.c.l.bf16 %v2042_v52 }
 0x33b   : > { %1534 = vpow.bf16 %v914_v3  ;;  %v813_v9 = vpop.xlane.xlu1 %812 }
 0x33c   : > { %v854_v10 = vsub.f32 %v1944_v47, %v813_v9  ;;  %v855_v61 = vsub.f32 %v1946_v48, %v813_v9  ;;  %v1005_v62 = vadd.f32 %v963_v1, %v962_v6  ;;  %v1002_v63 = vadd.f32 %v961_v2, %v960_v7 }
 0x33e   : > { %v880_v11 = vpack.c.bf16 %v854_v10, %v852_v4  ;;  %v881_v12 = vpack.c.bf16 %v855_v61, %v853_v5  ;;  %1006 = vadd.xlane.f32.xlu0 %v1005_v62  ;;  %1003 = vadd.xlane.f32.xlu1 %v1002_v63 }
 0x33f   : > { %v804_v47 = vpop.xlane.xlu1 %803 }
 0x340   : > { %v2062_v48 = vpop.eup %1528  ;;  %v905_v60 = vmul.bf16 1069105081, %v880_v11  ;;  %v908_v16 = vmul.bf16 1069105081, %v881_v12  ;;  %v848_v17 = vsub.f32 %v1932_v41, %v804_v47  ;;  %v849_v18 = vsub.f32 %v1934_v42, %v804_v47 }
 0x341   : > { %v2066_v19 = vpop.eup %1530  ;;  %v958_v20 = vunpack.c.h.bf16 %v2062_v48  ;;  %v956_v21 = vunpack.c.l.bf16 %v2062_v48 }
 0x342   : > { %1536 = vpow.bf16 %v905_v60  ;;  %v878_v43 = vpack.c.bf16 %v850_v45, %v848_v17  ;;  %v879_v22 = vpack.c.bf16 %v851_v46, %v849_v18  ;;  %v959_v44 = vunpack.c.h.bf16 %v2066_v19 }
 0x343   : > { %1538 = vpow.bf16 %v908_v16  ;;  %v798_v23 = vpop.xlane.xlu1 %797  ;;  %v957_v41 = vunpack.c.l.bf16 %v2066_v19 }
 0x344   : > { %v899_v42 = vmul.bf16 1069105081, %v878_v43  ;;  %v902_v28 = vmul.bf16 1069105081, %v879_v22  ;;  %v844_v29 = vsub.f32 %v1924_v37, %v798_v23  ;;  %v845_v30 = vsub.f32 %v1926_v38, %v798_v23 }
 0x345   : > { %v999_v31 = vadd.f32 %v959_v44, %v958_v20  ;;  %v996_v39 = vadd.f32 %v957_v41, %v956_v21 }
 0x346   : > { %1540 = vpow.bf16 %v899_v42  ;;  %v876_v40 = vpack.c.bf16 %v846_v53, %v844_v29  ;;  %v877_v32 = vpack.c.bf16 %v847_v55, %v845_v30  ;;  %v1512_v29 = vld [vmem:[#allocation4 + $0x4] ss:$8 sps:$4 sm:$0xff]   ;;  %v1515_v30 = vld [vmem:[#allocation4 + $0x14] ss:$8 sps:$4 sm:$0xff]  }
 0x347   : > { %1542 = vpow.bf16 %v902_v28  ;;  %1000 = vadd.xlane.f32.xlu0 %v999_v31  ;;  %997 = vadd.xlane.f32.xlu1 %v996_v39 }
 0x348   : > { %v2084_v33 = vpop.eup %1532  ;;  %v893_v37 = vmul.bf16 1069105081, %v876_v40  ;;  %v896_v38 = vmul.bf16 1069105081, %v877_v32  ;;  %1144 = vmatprep.mubr.bf16.mxu0 %v1512_v29  ;;  %1152 = vmatprep.mubr.bf16.mxu1 %v1515_v30 }
 0x349   : > { %v2086_v34 = vpop.eup %1534  ;;  %v954_v35 = vunpack.c.h.bf16 %v2084_v33  ;;  %v952_v36 = vunpack.c.l.bf16 %v2084_v33 }
 0x34a   : > { %1544 = vpow.bf16 %v893_v37  ;;  %v955_v49 = vunpack.c.h.bf16 %v2086_v34  ;;  %v953_v51 = vunpack.c.l.bf16 %v2086_v34 }
 0x34b   : > { %1546 = vpow.bf16 %v896_v38 }
 0x34c   : > { %v993_v3 = vadd.f32 %v955_v49, %v954_v35  ;;  %v990_v8 = vadd.f32 %v953_v51, %v952_v36 }
 0x34e   : > { %994 = vadd.xlane.f32.xlu0 %v993_v3  ;;  %991 = vadd.xlane.f32.xlu1 %v990_v8 }
 0x350   : > { %v2100_v4 = vpop.eup %1536 }
 0x351   : > { %v2102_v5 = vpop.eup %1538  ;;  %v950_v9 = vunpack.c.h.bf16 %v2100_v4  ;;  %v948_v10 = vunpack.c.l.bf16 %v2100_v4 }
 0x352   : > { %v951_v61 = vunpack.c.h.bf16 %v2102_v5  ;;  %v949_v62 = vunpack.c.l.bf16 %v2102_v5 }
 0x354   : > { %v2108_v63 = vpop.eup %1540  ;;  %v987_v11 = vadd.f32 %v951_v61, %v950_v9  ;;  %v984_v12 = vadd.f32 %v949_v62, %v948_v10 }
 0x355   : > { %v2118_v45 = vpop.eup %1542  ;;  %v946_v46 = vunpack.c.h.bf16 %v2108_v63  ;;  %v944_v47 = vunpack.c.l.bf16 %v2108_v63 }
 0x356   : > { %988 = vadd.xlane.f32.xlu0 %v987_v11  ;;  %985 = vadd.xlane.f32.xlu1 %v984_v12  ;;  %v947_v59 = vunpack.c.h.bf16 %v2118_v45  ;;  %v945_v60 = vunpack.c.l.bf16 %v2118_v45 }
 0x358   : > { %v2124_v16 = vpop.eup %1544  ;;  %v981_v17 = vadd.f32 %v947_v59, %v946_v46  ;;  %v978_v18 = vadd.f32 %v945_v60, %v944_v47 }
 0x359   : > { %v2134_v43 = vpop.eup %1546  ;;  %v942_v22 = vunpack.c.h.bf16 %v2124_v16  ;;  %v940_v53 = vunpack.c.l.bf16 %v2124_v16 }
 0x35a   : > { %982 = vadd.xlane.f32.xlu0 %v981_v17  ;;  %979 = vadd.xlane.f32.xlu1 %v978_v18  ;;  %v943_v55 = vunpack.c.h.bf16 %v2134_v43  ;;  %v941_v23 = vunpack.c.l.bf16 %v2134_v43  ;;  %v1510_v43 = vld [vmem:[#allocation4] ss:$8 sps:$4 sm:$0xff]  }
 0x35c   : > { %v975_v42 = vadd.f32 %v943_v55, %v942_v22  ;;  %v972_v28 = vadd.f32 %v941_v23, %v940_v53 }
 0x35e   : > { %976 = vadd.xlane.f32.xlu0 %v975_v42  ;;  %973 = vadd.xlane.f32.xlu1 %v972_v28 }
 0x3b7   : > { %v1019_v31 = vpop.xlane.xlu0 %1018  ;;  %v1016_v39 = vpop.xlane.xlu1 %1015 }
 0x3b8   : > { %1548 = vrcp.f32 %v1019_v31 }
 0x3b9   : > { %1550 = vrcp.f32 %v1016_v39 }
 0x3bf   : > { %v1013_v40 = vpop.xlane.xlu0 %1012  ;;  %v1010_v32 = vpop.xlane.xlu1 %1009 }
 0x3c0   : > { %1552 = vrcp.f32 %v1013_v40 }
 0x3c1   : > { %1554 = vrcp.f32 %v1010_v32 }
 0x3c5   : > { %v1549_v37 = vpop.eup %1548 }
 0x3c6   : > { %v1551_v38 = vpop.eup %1550  ;;  %v1067_v3 = vmul.f32 %v1549_v37, %v971_v57  ;;  %v1066_v8 = vmul.f32 %v1549_v37, %v970_v14 }
 0x3c7   : > { %v1007_v11 = vpop.xlane.xlu0 %1006  ;;  %v1004_v12 = vpop.xlane.xlu1 %1003  ;;  %v1065_v17 = vmul.f32 %v1551_v38, %v969_v58  ;;  %v1064_v18 = vmul.f32 %v1551_v38, %v968_v15 }
 0x3c8   : > { %1556 = vrcp.f32 %v1007_v11 }
 0x3c9   : > { %1558 = vrcp.f32 %v1004_v12  ;;  %v1083_v42 = vpack.c.bf16 %v1067_v3, %v1065_v17  ;;  %v1082_v28 = vpack.c.bf16 %v1066_v8, %v1064_v18 }
 0x3cb   : > { %1112 = vmatprep.subr.bf16.mxu0 %v1083_v42  ;;  %1392 = vmatprep.subr.bf16.mxu1 %v1083_v42 }
 0x3cc   : > { %1113 = vmatpush1.bf16.xpose.msra.mxu0 %v1082_v28  ;;  %1400 = vmatpush1.bf16.xpose.msra.mxu1 %v1082_v28 }
 0x3cd   : > { %v1553_v57 = vpop.eup %1552 }
 0x3ce   : > { %v1555_v29 = vpop.eup %1554  ;;  %v1063_v14 = vmul.f32 %v1553_v57, %v967_v26  ;;  %v1062_v13 = vmul.f32 %v1553_v57, %v966_v24 }
 0x3cf   : > { %v1061_v0 = vmul.f32 %v1555_v29, %v965_v27  ;;  %v1060_v15 = vmul.f32 %v1555_v29, %v964_v25 }
 0x3d0   : > { %v1001_v58 = vpop.xlane.xlu0 %1000  ;;  %v998_v30 = vpop.xlane.xlu1 %997 }
 0x3d1   : > { %1560 = vrcp.f32 %v1001_v58  ;;  %v1081_v31 = vpack.c.bf16 %v1063_v14, %v1061_v0  ;;  %v1080_v39 = vpack.c.bf16 %v1062_v13, %v1060_v15 }
 0x3d2   : > { %1562 = vrcp.f32 %v998_v30 }
 0x3d3   : > { %1114 = vmatprep.subr.bf16.mxu0 %v1081_v31  ;;  %1393 = vmatprep.subr.bf16.mxu1 %v1081_v31  ;;  %v1090_v31 = vld [vmem:[%s1853_s19 + $0x10] sm:$0xff] }
 0x3d4   : > { %1115 = vmatpush1.bf16.xpose.msra.mxu0 %v1080_v39  ;;  %1401 = vmatpush1.bf16.xpose.msra.mxu1 %v1080_v39 }
 0x3d5   : > { %v1557_v26 = vpop.eup %1556 }
 0x3d6   : > { %v1559_v40 = vpop.eup %1558  ;;  %v1059_v24 = vmul.f32 %v1557_v26, %v963_v1  ;;  %v1058_v56 = vmul.f32 %v1557_v26, %v962_v6 }
 0x3d7   : > { %v995_v54 = vpop.xlane.xlu0 %994  ;;  %v992_v25 = vpop.xlane.xlu1 %991  ;;  %v1057_v27 = vmul.f32 %v1559_v40, %v961_v2  ;;  %v1056_v32 = vmul.f32 %v1559_v40, %v960_v7 }
 0x3d8   : > { %1564 = vrcp.f32 %v995_v54 }
 0x3d9   : > { %1566 = vrcp.f32 %v992_v25  ;;  %v1079_v37 = vpack.c.bf16 %v1059_v24, %v1057_v27  ;;  %v1078_v38 = vpack.c.bf16 %v1058_v56, %v1056_v32  ;;  %v1089_v24 = vld [vmem:[%s1853_s19 + $0x8] sm:$0xff]  ;;  %v1091_v56 = vld [vmem:[%s1853_s19 + $0x18] sm:$0xff] }
 0x3db   : > { %1116 = vmatprep.subr.bf16.mxu0 %v1079_v37  ;;  %1394 = vmatprep.subr.bf16.mxu1 %v1079_v37 }
 0x3dc   : > { %1117 = vmatpush1.bf16.xpose.msra.mxu0 %v1078_v38  ;;  %1402 = vmatpush1.bf16.xpose.msra.mxu1 %v1078_v38 }
 0x3de   : > { %v1561_v1 = vpop.eup %1560 }
 0x3df   : > { %v1563_v3 = vpop.eup %1562  ;;  %v989_v8 = vpop.xlane.xlu0 %988  ;;  %v1055_v11 = vmul.f32 %v1561_v1, %v959_v44  ;;  %v1054_v52 = vmul.f32 %v1561_v1, %v958_v20 }
 0x3e0   : > { %v986_v6 = vpop.xlane.xlu1 %985  ;;  %1568 = vrcp.f32 %v989_v8  ;;  %v1053_v50 = vmul.f32 %v1563_v3, %v957_v41  ;;  %v1052_v7 = vmul.f32 %v1563_v3, %v956_v21 }
 0x3e1   : > { %1570 = vrcp.f32 %v986_v6 }
 0x3e2   : > { %v1077_v2 = vpack.c.bf16 %v1055_v11, %v1053_v50  ;;  %v1076_v12 = vpack.c.bf16 %v1054_v52, %v1052_v7 }
 0x3e3   : > { %v983_v17 = vpop.xlane.xlu0 %982 }
 0x3e4   : > { %v980_v18 = vpop.xlane.xlu1 %979  ;;  %1118 = vmatprep.subr.bf16.mxu0 %v1077_v2  ;;  %1395 = vmatprep.subr.bf16.mxu1 %v1077_v2  ;;  %1572 = vrcp.f32 %v983_v17 }
 0x3e5   : > { %v1565_v42 = vpop.eup %1564  ;;  %1119 = vmatpush1.bf16.xpose.msra.mxu0 %v1076_v12  ;;  %1403 = vmatpush1.bf16.xpose.msra.mxu1 %v1076_v12  ;;  %1574 = vrcp.f32 %v980_v18 }
 0x3e6   : > { %v1567_v20 = vpop.eup %1566  ;;  %v1051_v19 = vmul.f32 %v1565_v42, %v955_v49  ;;  %v1050_v48 = vmul.f32 %v1565_v42, %v954_v35 }
 0x3e7   : > { %v977_v21 = vpop.xlane.xlu0 %976  ;;  %v1049_v41 = vmul.f32 %v1567_v20, %v953_v51  ;;  %v1048_v28 = vmul.f32 %v1567_v20, %v952_v36 }
 0x3e8   : > { %v974_v44 = vpop.xlane.xlu1 %973  ;;  %1576 = vrcp.f32 %v977_v21 }
 0x3e9   : > { %1578 = vrcp.f32 %v974_v44  ;;  %v1075_v57 = vpack.c.bf16 %v1051_v19, %v1049_v41  ;;  %v1074_v29 = vpack.c.bf16 %v1050_v48, %v1048_v28 }
 0x3eb   : > { %1120 = vmatprep.subr.bf16.mxu0 %v1075_v57  ;;  %1396 = vmatprep.subr.bf16.mxu1 %v1075_v57 }
 0x3ed   : > { %v1569_v14 = vpop.eup %1568  ;;  %1121 = vmatpush1.bf16.xpose.msra.mxu0 %v1074_v29  ;;  %1404 = vmatpush1.bf16.xpose.msra.mxu1 %v1074_v29 }
 0x3ee   : > { %v1571_v49 = vpop.eup %1570  ;;  %v1047_v35 = vmul.f32 %v1569_v14, %v951_v61  ;;  %v1046_v34 = vmul.f32 %v1569_v14, %v950_v9 }
 0x3ef   : > { %v1045_v33 = vmul.f32 %v1571_v49, %v949_v62  ;;  %v1044_v36 = vmul.f32 %v1571_v49, %v948_v10 }
 0x3f1   : > { %v1573_v51 = vpop.eup %1572  ;;  %v1073_v13 = vpack.c.bf16 %v1047_v35, %v1045_v33  ;;  %v1072_v0 = vpack.c.bf16 %v1046_v34, %v1044_v36 }
 0x3f2   : > { %v1575_v15 = vpop.eup %1574  ;;  %v1043_v58 = vmul.f32 %v1573_v51, %v947_v59  ;;  %v1042_v10 = vmul.f32 %v1573_v51, %v946_v46 }
 0x3f3   : > { %1122 = vmatprep.subr.bf16.mxu0 %v1073_v13  ;;  %1397 = vmatprep.subr.bf16.mxu1 %v1073_v13  ;;  %v1041_v61 = vmul.f32 %v1575_v15, %v945_v60  ;;  %v1040_v4 = vmul.f32 %v1575_v15, %v944_v47 }
 0x3f5   : > { %v1577_v30 = vpop.eup %1576  ;;  %1123 = vmatpush1.bf16.xpose.msra.mxu0 %v1072_v0  ;;  %1405 = vmatpush1.bf16.xpose.msra.mxu1 %v1072_v0  ;;  %v1071_v5 = vpack.c.bf16 %v1043_v58, %v1041_v61  ;;  %v1070_v59 = vpack.c.bf16 %v1042_v10, %v1040_v4 }
 0x3f6   : > { %v1579_v9 = vpop.eup %1578  ;;  %v1039_v45 = vmul.f32 %v1577_v30, %v943_v55  ;;  %v1038_v46 = vmul.f32 %v1577_v30, %v942_v22  ;;  %v1513_v55 = vld [vmem:[#allocation4 + $0x10] ss:$8 sps:$4 sm:$0xff]  }
 0x3f7   : > { %1124 = vmatprep.subr.bf16.mxu0 %v1071_v5  ;;  %1398 = vmatprep.subr.bf16.mxu1 %v1071_v5  ;;  %v1037_v62 = vmul.f32 %v1579_v9, %v941_v23  ;;  %v1036_v63 = vmul.f32 %v1579_v9, %v940_v53  ;;  %v1088_v23 = vld [vmem:[%s1853_s19] sm:$0xff]  ;;  %s1166_s19 = scalar_lea.sflag [#allocation8], %s1849_s8 }
 0x3f9   : > { %v1069_v60 = vpack.c.bf16 %v1039_v45, %v1037_v62  ;;  %v1068_v47 = vpack.c.bf16 %v1038_v46, %v1036_v63 }
 0x3fd   : > { %1125 = vmatpush1.bf16.xpose.msra.mxu0 %v1070_v59  ;;  %1406 = vmatpush1.bf16.xpose.msra.mxu1 %v1070_v59 }
 0x3fe   : > { %1126 = vmatprep.subr.bf16.mxu0 %v1069_v60  ;;  %1399 = vmatprep.subr.bf16.mxu1 %v1069_v60 }
 0x405   : > { %1127 = vmatpush1.bf16.xpose.msra.mxu0 %v1068_v47  ;;  %1407 = vmatpush1.bf16.xpose.msra.mxu1 %v1068_v47 }
 0x40c   : > { %1145 = vmatmul.mubr.bf16.vlgmr.msra.gmra.mxu0 %v1510_v43  ;;  %1153 = vmatmul.mubr.bf16.vlgmr.msra.gmra.mxu1 %v1513_v55 }
 0x4cc   : > { %v1146_v53 = vpop.f32.mrf.mxu0  ;;  %v1154_v39 = vpop.f32.mrf.mxu1 }
 0x4cd   : > { %v1147_v16 = vadd.f32 %v1146_v53, %v1088_v23  ;;  %v1155_v22 = vadd.f32 %v1154_v39, %v1090_v31 }
 0x4ce   : > { %v1148_v26 = vpop.f32.mrf.mxu0  ;;  %v1156_v40 = vpop.f32.mrf.mxu1 }
 0x4cf   : > { %1161 = vst [vmem:[%s1864_s12] sm:$0xff] %v1147_v16  ;;  %1163 = vst [vmem:[%s1864_s12 + $0x10] sm:$0xff] %v1155_v22 }
 0x4d0   : > { %v1149_v54 = vpop.f32.mrf.mxu0  ;;  %v1157_v25 = vpop.f32.mrf.mxu1 }
 0x4d1   : > { %v1150_v27 = vadd.f32 %v1149_v54, %v1089_v24  ;;  %v1158_v32 = vadd.f32 %v1157_v25, %v1091_v56 }
 0x4d2   : > { %v1151_v37 = vpop.f32.mrf.mxu0  ;;  %v1159_v38 = vpop.f32.mrf.mxu1 }
 0x4d3   : > { %1162 = vst [vmem:[%s1864_s12 + $0x8] sm:$0xff] %v1150_v27  ;;  %1164 = vst [vmem:[%s1864_s12 + $0x18] sm:$0xff] %v1158_v32 }
 0x4d4   : > { %1621 = shalt.err (!%p1618_p11)
}
 0x4d5   : > { %s1622_s12 = scalar_lea.hbm %s2224_s18, 512  ;;  %s1626_s16 = scalar_lea.hbm %s2286_s5, 2048 }
 0x4d6   : > { %p1623_p3 = scmp.ne.s32.totalorder %s2224_s18, %s1622_s12  ;;  %p1627_p0 = scmp.lt.s32.totalorder %s2224_s18, %s2286_s5 }
 0x4d7   : > { %p1628_p2 = scmp.lt.s32.totalorder %s1626_s16, %s1622_s12 }
 0x4d8   : > { %p1624_p13 = pnand %p1623_p3, %p1816_p9 }
 0x4d9   : > { %p1629_p8 = por %p1628_p2, %p1627_p0 }
 0x4da   : > { %p1625_p1 = pneg %p1624_p13 }
 0x4dc   : > { %p1630_p4 = pnand %p1629_p8, %p1625_p1 }
 0x4de   : > { %1633 = shalt.err (!%p1630_p4)
}
 0x4df   : > { %s1715_s29 = smov 128   ;;  %s1716_s30 = smov 256  }
 0x4e0   : > { %s1717_s24 = smov 8  }
 0x4e1   : > { %1410 = dma.vmem_to_hbm [thread:$0]  (%p1816_p9), %s2226_s14, 512, %s2224_s18, %s1166_s19, %s1715_s29, %s1716_s30, %s1717_s24  }
 0x4e2 PF: > { %s2298_s23 = sld [smem:[#allocation12_spill]]  ;;  %p1421_p5 = scmp.ge.s32.totalorder %s1704_s27, 2 }
 0x4e4   : > { %p1417_p6 = pnand %p1421_p5, %p1822_p12 }
 0x4e6   : > { %p1418_p7 = pneg %p1417_p6 }
 0x4e8   : > { %s1195_s3 = sand.u32 1, %s2298_s23  }
 0x4e9   : > { %s1196_s28 = scalar_lea.sflag [#allocation8], %s1195_s3 }
 0x4ea   : > { %1671 = dma.done.wait (%p1418_p7), %s1196_s28, 512  }
 0x4eb   : > { %1673 = vsyncadd (%p1418_p7), %s1196_s28, 4294966784  ;;  %s22_s27 = sadd.s32 1, %s1704_s27   ;;  %s2299_s10 = sld [smem:[#allocation13_spill]] }
 0x4ec   : > { %p19_p10 = scmp.ge.s32.totalorder %s22_s27, 6   ;;  %s2300_s8 = sld [smem:[#allocation14_spill]] }
 0x4ed   : > { %s2301_s20 = smov %s1680_s21  ;;  %s2302_s21 = smov %s1684_s22 }
 0x4ee   : > { %s2303_s22 = smov %s1829_s15  ;;  %s2304_s23 = smov %s1696_s25 }
 0x4ef   : > { %s2305_s24 = smov %s1700_s26  ;;  %21 = sbr.rel (!%p19_p10) target bundleno = 9 (0x9), region = 93 }
 0x4f1   : > { %s2306_s25 = smov %s2299_s10 }
 0x4f2   : > { %s2307_s26 = smov %s2300_s8 }
 0x4f4   :  { %1201 = vsyncpa [#allocation7], 1 }
 0x4f5   :  { %1203 = vsyncpa [#allocation7 + $0x1], 1 }
 0x4f6   :  { %1204 = vsyncpa [#allocation8], 1 }
 0x4f7   :  { %1206 = vsyncpa [#allocation8 + $0x1], 1 }

</bundles_post_ra>
